<compile_context>
chip_gen: v7x
topology: tpu7x:2x2x1
jax: 0.10.0
libtpu: 0.0.40
codegen_flags: <defaults>
</compile_context>

<pallas_src>
import numpy as np
import jax
import jax.numpy as jnp
from jax.experimental import pallas as pl
from jax.experimental.pallas import tpu as pltpu


def _round_up(x, m):
    return ((x + m - 1) // m) * m


# --------------------- prologue: tiled Tucker contraction + bn1 --------------
def tuckert_contract_kernel(rel3_ref, lhs_ref, w3_ref, bn1s_ref, bn1b_ref,
                            xbn_ref, acc_ref):
    """One (batch-tile, rel-chunk) step of
         x[b, j] += sum_k rel_t[b, k] * (lhs_bn[b, :] @ W[k, :, :])[j]
    rel3_ref: (Bt, tk, 1) f32   lhs_ref: (Bt, D) f32   w3_ref: (tk, D, D) bf16
    """
    ki = pl.program_id(1)

    @pl.when(ki == 0)
    def _init():
        acc_ref[...] = jnp.zeros_like(acc_ref)

    lhs16 = lhs_ref[...].astype(jnp.bfloat16)           # bf16 matmul operand
    rel3 = rel3_ref[...]                                 # (Bt, tk, 1) f32
    part = jnp.zeros(acc_ref.shape, jnp.float32)
    # Static unroll over the rel-chunk; each k is a plain 2-D MXU matmul with
    # f32 accumulation, then an f32 per-row scale (cheap VPU work under MXU).
    for k in range(rel3_ref.shape[1]):
        t = jnp.dot(lhs16, w3_ref[k], preferred_element_type=jnp.float32)
        part = part + rel3[:, k, :] * t                  # (Bt,1)*(Bt,D)
    acc_ref[...] += part

    @pl.when(ki == pl.num_programs(1) - 1)
    def _finalize():
        # bn1 (eval mode) applied once on the finished accumulator.
        xbn_ref[...] = acc_ref[...] * bn1s_ref[...] + bn1b_ref[...]


# --------------------- scoring: stream E^T, pred tile = xbn @ E^T tile -------
def tuckert_score_kernel(xbn_ref, et_ref, pred_ref):
    # E^T tile is streamed in a narrow dtype (bf16 by default) and widened
    # in-kernel (cheap cast, hidden under the HBM stream); the query side
    # (xbn) stays f32, accumulation is f32.
    pred_ref[...] = jnp.dot(
        xbn_ref[...], et_ref[...].astype(jnp.float32),
        preferred_element_type=jnp.float32,
    ).astype(pred_ref.dtype)


# --------------------- one-time preprocessing of static tensors --------------
def prepare_params(params, *, et_dtype=jnp.bfloat16):
    """Pre-transpose + pre-cast the entity table for the streaming kernel and
    pre-cast the core tensor for the prologue, so the per-forward XLA
    transpose/cast of the largest arrays is not paid on every call."""
    p = dict(params)
    p["_E_T"] = params["E"].T.astype(et_dtype)           # (dim, n_ent)
    p["_W3"] = params["W"].astype(jnp.bfloat16)           # (dim, dim, dim)
    return p


# --------------------- forward ------------------------------------------------
def tuckert_forward(x, params, *, batch_tile=None, rel_chunk=None,
                    tile_e=4096, min_entity_tiles=8, et_dtype=jnp.bfloat16):
    E_w, R_w, T_w, RnoT_w, W = (params[k] for k in ("E", "R", "T", "R_noT", "W"))
    bn0, bn1 = params["bn0"], params["bn1"]
    n_ent, dim = E_w.shape
    B = x.shape[0]
    eps = 1e-5

    # ---- tiny glue in plain jnp: gathers, bn coefficients, rel*time ---------
    lhs = jnp.take(E_w, x[:, 0], axis=0)
    rel = jnp.take(R_w, x[:, 1], axis=0)
    rel_no_time = jnp.take(RnoT_w, x[:, 1], axis=0)
    rhs = jnp.take(E_w, x[:, 2], axis=0)
    time = jnp.take(T_w, x[:, 3], axis=0)

    bn0_scale = bn0["weight"] / jnp.sqrt(bn0["running_var"] + eps)
    bn0_shift = bn0["bias"] - bn0["running_mean"] * bn0_scale
    bn1_sv = bn1["weight"] / jnp.sqrt(bn1["running_var"] + eps)
    bn1_scale = bn1_sv.reshape(1, dim)
    bn1_shift = (bn1["bias"] - bn1["running_mean"] * bn1_sv).reshape(1, dim)

    rel_t = rel * time
    lhs_bn = lhs * bn0_scale + bn0_shift                  # bn0, eval mode
    # TODO(synk): input/hidden dropouts are identity (eval mode).

    # ---- prologue tiling ----------------------------------------------------
    if batch_tile is None:
        batch_tile = B if B <= 128 else 128
    batch_tile = min(batch_tile, B)
    assert batch_tile == B or batch_tile % 8 == 0, "batch_tile must be 8-aligned"
    if rel_chunk is None:
        rel_chunk = dim
    assert dim % rel_chunk == 0, "rel_chunk must divide dim"
    assert rel_chunk == dim or rel_chunk % 8 == 0, "rel_chunk must be 8-aligned"
    grid_b = pl.cdiv(B, batch_tile)
    grid_k = dim // rel_chunk

    w3 = params.get("_W3")
    if w3 is None:      # fallback: per-call cast; prefer prepare_params()
        w3 = W.astype(jnp.bfloat16)
    rel3 = rel_t.reshape(B, dim, 1)                       # rel index on sublanes

    prologue_vmem = (
        2 * rel_chunk * _round_up(dim, 8) * _round_up(dim, 128) * 2     # W chunk
        + 2 * batch_tile * _round_up(rel_chunk, 8) * 128 * 4            # rel3
        + 5 * _round_up(batch_tile, 8) * _round_up(dim, 128) * 4        # lhs/xbn/acc
    )
    prologue_vmem = int(min(max(4 * prologue_vmem + (2 << 20), 4 << 20), 120 << 20))

    xbn = pl.pallas_call(
        tuckert_contract_kernel,
        grid=(grid_b, grid_k),
        in_specs=[
            pl.BlockSpec((batch_tile, rel_chunk, 1), lambda bi, ki: (bi, ki, 0)),
            pl.BlockSpec((batch_tile, dim), lambda bi, ki: (bi, 0)),
            pl.BlockSpec((rel_chunk, dim, dim), lambda bi, ki: (ki, 0, 0)),
            pl.BlockSpec((1, dim), lambda bi, ki: (0, 0)),
            pl.BlockSpec((1, dim), lambda bi, ki: (0, 0)),
        ],
        out_specs=pl.BlockSpec((batch_tile, dim), lambda bi, ki: (bi, 0)),
        out_shape=jax.ShapeDtypeStruct((B, dim), jnp.float32),
        scratch_shapes=[pltpu.VMEM((batch_tile, dim), jnp.float32)],
        compiler_params=pltpu.CompilerParams(
            dimension_semantics=("parallel", "arbitrary"),
            vmem_limit_bytes=prologue_vmem),
    )(rel3, lhs_bn, w3, bn1_scale, bn1_shift)

    # ---- streaming scorer: pred = xbn @ E^T over entity tiles ---------------
    e_t = params.get("_E_T")
    if e_t is None:     # fallback: per-call transpose+cast; prefer prepare_params()
        e_t = E_w.T.astype(et_dtype)
    et_bytes = jnp.dtype(e_t.dtype).itemsize

    # >= min_entity_tiles grid steps (double-buffering + megacore on v7x),
    # lane-dense multiples of 128, capped at tile_e; no padding of E or pred.
    tile = max(128, _round_up(pl.cdiv(n_ent, min_entity_tiles), 128))
    tile = min(tile, tile_e, _round_up(n_ent, 128))
    grid_e = pl.cdiv(n_ent, tile)

    score_vmem = (2 * dim * tile * et_bytes                         # E^T tiles
                  + 2 * B * tile * 4                                # pred tiles
                  + 2 * _round_up(B, 8) * _round_up(dim, 128) * 4)  # xbn
    score_vmem = int(min(max(2 * score_vmem + (2 << 20), 8 << 20), 120 << 20))

    pred = pl.pallas_call(
        tuckert_score_kernel,
        grid=(grid_e,),
        in_specs=[
            pl.BlockSpec((B, dim), lambda e: (0, 0)),       # xbn, grid-invariant
            pl.BlockSpec((dim, tile), lambda e: (0, e)),    # E^T entity tile
        ],
        out_specs=pl.BlockSpec((B, tile), lambda e: (0, e)),
        out_shape=jax.ShapeDtypeStruct((B, n_ent), jnp.float32),
        compiler_params=pltpu.CompilerParams(
            dimension_semantics=("parallel",),
            vmem_limit_bytes=score_vmem),
    )(xbn, e_t)

    # ---- regularizer: tiny reductions, plain jnp (matches torch.norm(p=4)) --
    # NOTE: `lhs` is regularized AFTER bn0, as in the PyTorch module; sum(W**4)
    # is computed here (outside the kernel) so the prologue can tile over k.
    regularizer = (
        jnp.sum(lhs_bn ** 4) ** 0.25,
        jnp.sum(rel_t ** 4) ** 0.25,
        jnp.sum(rel_no_time ** 4) ** 0.25,
        jnp.sum(rhs ** 4) ** 0.25,
        jnp.sum(W ** 4) ** 0.25,        # same elements as W.view(dim, dim*dim)
    )
    return pred, regularizer, T_w


# --------------------- plain NumPy reference (eval mode) ---------------------
def _reference_forward(x, params):
    E = np.asarray(params["E"], np.float64)
    R = np.asarray(params["R"], np.float64)
    T = np.asarray(params["T"], np.float64)
    RnoT = np.asarray(params["R_noT"], np.float64)
    W = np.asarray(params["W"], np.float64)
    xq = np.asarray(x)
    dim = E.shape[1]
    eps = 1e-5

    def bn(v, p):
        w = np.asarray(p["weight"], np.float64)
        b = np.asarray(p["bias"], np.float64)
        m = np.asarray(p["running_mean"], np.float64)
        var = np.asarray(p["running_var"], np.float64)
        return (v - m) / np.sqrt(var + eps) * w + b

    lhs = E[xq[:, 0]]
    rel = R[xq[:, 1]]
    rel_no_time = RnoT[xq[:, 1]]
    rhs = E[xq[:, 2]]
    time = T[xq[:, 3]]
    rel_t = rel * time
    lhs_bn = bn(lhs, params["bn0"])
    w_mat = (rel_t @ W.reshape(dim, dim * dim)).reshape(-1, dim, dim)
    xv = np.einsum("bi,bij->bj", lhs_bn, w_mat)
    xbn = bn(xv, params["bn1"])
    pred = xbn @ E.T
    reg = tuple(np.sum(v ** 4) ** 0.25
                for v in (lhs_bn, rel_t, rel_no_time, rhs, W))
    return pred, reg


if __name__ == "__main__":
    # sizes = (n_entities, n_relations, n_entities, n_timestamps)
    n_entities, n_relations, n_timestamps = 256, 16, 24
    dim = 32
    B = 16

    key = jax.random.PRNGKey(0)
    ks = jax.random.split(key, 11)

    def emb(kk, n):
        w = jax.random.normal(kk, (n, dim), dtype=jnp.float32)
        return w.at[0].set(0.0)          # padding_idx=0

    def bn_params(kk):
        k1, k2, k3, k4 = jax.random.split(kk, 4)
        return {
            "weight": 1.0 + 0.2 * jax.random.normal(k1, (dim,), jnp.float32),
            "bias": 0.1 * jax.random.normal(k2, (dim,), jnp.float32),
            "running_mean": 0.1 * jax.random.normal(k3, (dim,), jnp.float32),
            "running_var": jax.random.uniform(k4, (dim,), jnp.float32, 0.5, 1.5),
        }

    params = {
        "E": emb(ks[0], n_entities),
        "R": emb(ks[1], n_relations),
        "T": emb(ks[2], n_timestamps),
        "R_noT": emb(ks[3], n_relations),
        "W": jax.random.uniform(ks[4], (dim, dim, dim), dtype=jnp.float32,
                                minval=-1.0, maxval=1.0),
        "bn0": bn_params(ks[9]),
        "bn1": bn_params(ks[10]),
    }

    x = jnp.stack([
        jax.random.randint(ks[5], (B,), 0, n_entities),
        jax.random.randint(ks[6], (B,), 0, n_relations),
        jax.random.randint(ks[7], (B,), 0, n_entities),
        jax.random.randint(ks[8], (B,), 0, n_timestamps),
    ], axis=1).astype(jnp.int32)

    # One-time preprocessing of the big/static tensors (E^T bf16, W bf16).
    prepared = prepare_params(params)

    # batch_tile=8 / rel_chunk=8 exercise the tiled prologue (grid 2 x 4);
    # the entity stream runs with two 128-wide tiles at this toy size.
    pred, regularizer, t_weight = tuckert_forward(
        x, prepared, batch_tile=8, rel_chunk=8)
    jax.block_until_ready(pred)
    jax.block_until_ready(regularizer)

    # ---- sanity checks vs plain-NumPy eval-mode reference -------------------
    pred_ref, reg_ref = _reference_forward(x, params)
    pred_np = np.asarray(pred)
    assert pred_np.shape == (B, n_entities)
    scale = np.max(np.abs(pred_ref)) + 1.0
    err = np.max(np.abs(pred_np - pred_ref))
    # bf16 E stream + bf16 Tucker-core operands (f32 accumulation) -> loose tol.
    assert err < 2e-2 * scale, f"max abs err {err} vs scale {scale}"

    assert len(regularizer) == 5
    for r, rr in zip(regularizer, reg_ref):
        assert np.isfinite(float(r))
        assert abs(float(r) - float(rr)) < 2e-3 * (abs(float(rr)) + 1.0)
    assert t_weight.shape == (n_timestamps, dim)

    print("KERNEL_OK")
</pallas_src>

<mosaic_0001>
module attributes {stable_mosaic.version = 11 : i64} {
  func.func @tuckert_contract_kernel(%arg0: i32, %arg1: i32, %arg2: memref<8x8x1xf32, #tpu.memory_space<vmem>>, %arg3: memref<8x32xf32, #tpu.memory_space<vmem>>, %arg4: memref<8x32x32xbf16, #tpu.memory_space<vmem>>, %arg5: memref<1x32xf32, #tpu.memory_space<vmem>>, %arg6: memref<1x32xf32, #tpu.memory_space<vmem>>, %arg7: memref<8x32xf32, #tpu.memory_space<vmem>>, %arg8: memref<8x32xf32, #tpu.memory_space<vmem>>) attributes {dimension_semantics = [#tpu.dimension_semantics<parallel>, #tpu.dimension_semantics<arbitrary>], iteration_bounds = array<i64: 2, 4>, scalar_prefetch = 0 : i64, scratch_operands = 1 : i64, tpu.core_type = #tpu.core_type<tc>, window_params = [{transform_indices = @transform_0, window_bounds = array<i64: 8, 8, 1>}, {transform_indices = @transform_1, window_bounds = array<i64: 8, 32>}, {transform_indices = @transform_2, window_bounds = array<i64: 8, 32, 32>}, {pipeline_mode = #tpu.pipeline_mode<synchronous>, transform_indices = @transform_3, window_bounds = array<i64: 1, 32>}, {pipeline_mode = #tpu.pipeline_mode<synchronous>, transform_indices = @transform_4, window_bounds = array<i64: 1, 32>}, {transform_indices = @transform_5, window_bounds = array<i64: 8, 32>}]} {
    %c0_i32 = arith.constant 0 : i32
    %0 = arith.cmpi eq, %arg1, %c0_i32 : i32
    %1 = arith.extui %0 : i1 to i32
    %c0_i32_0 = arith.constant 0 : i32
    %2 = arith.cmpi ne, %1, %c0_i32_0 : i32
    scf.if %2 {
      %cst_35 = arith.constant 0.000000e+00 : f32
      %77 = vector.broadcast %cst_35 : f32 to vector<8x32xf32>
      %c0_36 = arith.constant 0 : index
      %c0_37 = arith.constant 0 : index
      %78 = vector.load %arg8[%c0_36, %c0_37] : memref<8x32xf32, #tpu.memory_space<vmem>>, vector<8x32xf32>
      tpu.vector_store %arg8[%c0_36, %c0_37], %77 {strides = array<i32>} : memref<8x32xf32, #tpu.memory_space<vmem>>, vector<8x32xf32>,
    } else {
    }
    %c0 = arith.constant 0 : index
    %c0_1 = arith.constant 0 : index
    %3 = vector.load %arg3[%c0, %c0_1] : memref<8x32xf32, #tpu.memory_space<vmem>>, vector<8x32xf32>
    %4 = arith.truncf %3 : vector<8x32xf32> to vector<8x32xbf16>
    %c0_2 = arith.constant 0 : index
    %c0_3 = arith.constant 0 : index
    %c0_4 = arith.constant 0 : index
    %5 = vector.load %arg2[%c0_2, %c0_3, %c0_4] : memref<8x8x1xf32, #tpu.memory_space<vmem>>, vector<8x8x1xf32>
    %cst = arith.constant 0.000000e+00 : f32
    %6 = vector.broadcast %cst : f32 to vector<8x32xf32>
    %c0_5 = arith.constant 0 : index
    %c0_6 = arith.constant 0 : index
    %c0_7 = arith.constant 0 : index
    %7 = vector.load %arg4[%c0_5, %c0_6, %c0_7] : memref<8x32x32xbf16, #tpu.memory_space<vmem>>, vector<1x32x32xbf16>
    %8 = vector.shape_cast %7 : vector<1x32x32xbf16> to vector<32x32xbf16>
    %cst_8 = arith.constant dense<0.000000e+00> : vector<8x32xf32>
    %9 = tpu.matmul %4, %8, %cst_8 {dimension_numbers = #tpu.dot_dimension_numbers<[1], [0], [0], [1], [0, 0, 1, 1], [], []>} : vector<8x32xbf16>, vector<32x32xbf16>, vector<8x32xf32> -> vector<8x32xf32>
    %10 = vector.extract_strided_slice %5 {offsets = [0, 0, 0], sizes = [8, 1, 1], strides = [1, 1, 1]} : vector<8x8x1xf32> to vector<8x1x1xf32>
    %11 = vector.shape_cast %10 : vector<8x1x1xf32> to vector<8x1xf32>
    %12 = vector.broadcast %11 : vector<8x1xf32> to vector<8x32xf32>
    %13 = arith.mulf %12, %9 : vector<8x32xf32>
    %14 = arith.addf %6, %13 : vector<8x32xf32>
    %c1 = arith.constant 1 : index
    %c0_9 = arith.constant 0 : index
    %c0_10 = arith.constant 0 : index
    %15 = vector.load %arg4[%c1, %c0_9, %c0_10] : memref<8x32x32xbf16, #tpu.memory_space<vmem>>, vector<1x32x32xbf16>
    %16 = vector.shape_cast %15 : vector<1x32x32xbf16> to vector<32x32xbf16>
    %cst_11 = arith.constant dense<0.000000e+00> : vector<8x32xf32>
    %17 = tpu.matmul %4, %16, %cst_11 {dimension_numbers = #tpu.dot_dimension_numbers<[1], [0], [0], [1], [0, 0, 1, 1], [], []>} : vector<8x32xbf16>, vector<32x32xbf16>, vector<8x32xf32> -> vector<8x32xf32>
    %18 = vector.extract_strided_slice %5 {offsets = [0, 1, 0], sizes = [8, 1, 1], strides = [1, 1, 1]} : vector<8x8x1xf32> to vector<8x1x1xf32>
    %19 = vector.shape_cast %18 : vector<8x1x1xf32> to vector<8x1xf32>
    %20 = vector.broadcast %19 : vector<8x1xf32> to vector<8x32xf32>
    %21 = arith.mulf %20, %17 : vector<8x32xf32>
    %22 = arith.addf %14, %21 : vector<8x32xf32>
    %c2 = arith.constant 2 : index
    %c0_12 = arith.constant 0 : index
    %c0_13 = arith.constant 0 : index
    %23 = vector.load %arg4[%c2, %c0_12, %c0_13] : memref<8x32x32xbf16, #tpu.memory_space<vmem>>, vector<1x32x32xbf16>
    %24 = vector.shape_cast %23 : vector<1x32x32xbf16> to vector<32x32xbf16>
    %cst_14 = arith.constant dense<0.000000e+00> : vector<8x32xf32>
    %25 = tpu.matmul %4, %24, %cst_14 {dimension_numbers = #tpu.dot_dimension_numbers<[1], [0], [0], [1], [0, 0, 1, 1], [], []>} : vector<8x32xbf16>, vector<32x32xbf16>, vector<8x32xf32> -> vector<8x32xf32>
    %26 = vector.extract_strided_slice %5 {offsets = [0, 2, 0], sizes = [8, 1, 1], strides = [1, 1, 1]} : vector<8x8x1xf32> to vector<8x1x1xf32>
    %27 = vector.shape_cast %26 : vector<8x1x1xf32> to vector<8x1xf32>
    %28 = vector.broadcast %27 : vector<8x1xf32> to vector<8x32xf32>
    %29 = arith.mulf %28, %25 : vector<8x32xf32>
    %30 = arith.addf %22, %29 : vector<8x32xf32>
    %c3 = arith.constant 3 : index
    %c0_15 = arith.constant 0 : index
    %c0_16 = arith.constant 0 : index
    %31 = vector.load %arg4[%c3, %c0_15, %c0_16] : memref<8x32x32xbf16, #tpu.memory_space<vmem>>, vector<1x32x32xbf16>
    %32 = vector.shape_cast %31 : vector<1x32x32xbf16> to vector<32x32xbf16>
    %cst_17 = arith.constant dense<0.000000e+00> : vector<8x32xf32>
    %33 = tpu.matmul %4, %32, %cst_17 {dimension_numbers = #tpu.dot_dimension_numbers<[1], [0], [0], [1], [0, 0, 1, 1], [], []>} : vector<8x32xbf16>, vector<32x32xbf16>, vector<8x32xf32> -> vector<8x32xf32>
    %34 = vector.extract_strided_slice %5 {offsets = [0, 3, 0], sizes = [8, 1, 1], strides = [1, 1, 1]} : vector<8x8x1xf32> to vector<8x1x1xf32>
    %35 = vector.shape_cast %34 : vector<8x1x1xf32> to vector<8x1xf32>
    %36 = vector.broadcast %35 : vector<8x1xf32> to vector<8x32xf32>
    %37 = arith.mulf %36, %33 : vector<8x32xf32>
    %38 = arith.addf %30, %37 : vector<8x32xf32>
    %c4 = arith.constant 4 : index
    %c0_18 = arith.constant 0 : index
    %c0_19 = arith.constant 0 : index
    %39 = vector.load %arg4[%c4, %c0_18, %c0_19] : memref<8x32x32xbf16, #tpu.memory_space<vmem>>, vector<1x32x32xbf16>
    %40 = vector.shape_cast %39 : vector<1x32x32xbf16> to vector<32x32xbf16>
    %cst_20 = arith.constant dense<0.000000e+00> : vector<8x32xf32>
    %41 = tpu.matmul %4, %40, %cst_20 {dimension_numbers = #tpu.dot_dimension_numbers<[1], [0], [0], [1], [0, 0, 1, 1], [], []>} : vector<8x32xbf16>, vector<32x32xbf16>, vector<8x32xf32> -> vector<8x32xf32>
    %42 = vector.extract_strided_slice %5 {offsets = [0, 4, 0], sizes = [8, 1, 1], strides = [1, 1, 1]} : vector<8x8x1xf32> to vector<8x1x1xf32>
    %43 = vector.shape_cast %42 : vector<8x1x1xf32> to vector<8x1xf32>
    %44 = vector.broadcast %43 : vector<8x1xf32> to vector<8x32xf32>
    %45 = arith.mulf %44, %41 : vector<8x32xf32>
    %46 = arith.addf %38, %45 : vector<8x32xf32>
    %c5 = arith.constant 5 : index
    %c0_21 = arith.constant 0 : index
    %c0_22 = arith.constant 0 : index
    %47 = vector.load %arg4[%c5, %c0_21, %c0_22] : memref<8x32x32xbf16, #tpu.memory_space<vmem>>, vector<1x32x32xbf16>
    %48 = vector.shape_cast %47 : vector<1x32x32xbf16> to vector<32x32xbf16>
    %cst_23 = arith.constant dense<0.000000e+00> : vector<8x32xf32>
    %49 = tpu.matmul %4, %48, %cst_23 {dimension_numbers = #tpu.dot_dimension_numbers<[1], [0], [0], [1], [0, 0, 1, 1], [], []>} : vector<8x32xbf16>, vector<32x32xbf16>, vector<8x32xf32> -> vector<8x32xf32>
    %50 = vector.extract_strided_slice %5 {offsets = [0, 5, 0], sizes = [8, 1, 1], strides = [1, 1, 1]} : vector<8x8x1xf32> to vector<8x1x1xf32>
    %51 = vector.shape_cast %50 : vector<8x1x1xf32> to vector<8x1xf32>
    %52 = vector.broadcast %51 : vector<8x1xf32> to vector<8x32xf32>
    %53 = arith.mulf %52, %49 : vector<8x32xf32>
    %54 = arith.addf %46, %53 : vector<8x32xf32>
    %c6 = arith.constant 6 : index
    %c0_24 = arith.constant 0 : index
    %c0_25 = arith.constant 0 : index
    %55 = vector.load %arg4[%c6, %c0_24, %c0_25] : memref<8x32x32xbf16, #tpu.memory_space<vmem>>, vector<1x32x32xbf16>
    %56 = vector.shape_cast %55 : vector<1x32x32xbf16> to vector<32x32xbf16>
    %cst_26 = arith.constant dense<0.000000e+00> : vector<8x32xf32>
    %57 = tpu.matmul %4, %56, %cst_26 {dimension_numbers = #tpu.dot_dimension_numbers<[1], [0], [0], [1], [0, 0, 1, 1], [], []>} : vector<8x32xbf16>, vector<32x32xbf16>, vector<8x32xf32> -> vector<8x32xf32>
    %58 = vector.extract_strided_slice %5 {offsets = [0, 6, 0], sizes = [8, 1, 1], strides = [1, 1, 1]} : vector<8x8x1xf32> to vector<8x1x1xf32>
    %59 = vector.shape_cast %58 : vector<8x1x1xf32> to vector<8x1xf32>
    %60 = vector.broadcast %59 : vector<8x1xf32> to vector<8x32xf32>
    %61 = arith.mulf %60, %57 : vector<8x32xf32>
    %62 = arith.addf %54, %61 : vector<8x32xf32>
    %c7 = arith.constant 7 : index
    %c0_27 = arith.constant 0 : index
    %c0_28 = arith.constant 0 : index
    %63 = vector.load %arg4[%c7, %c0_27, %c0_28] : memref<8x32x32xbf16, #tpu.memory_space<vmem>>, vector<1x32x32xbf16>
    %64 = vector.shape_cast %63 : vector<1x32x32xbf16> to vector<32x32xbf16>
    %cst_29 = arith.constant dense<0.000000e+00> : vector<8x32xf32>
    %65 = tpu.matmul %4, %64, %cst_29 {dimension_numbers = #tpu.dot_dimension_numbers<[1], [0], [0], [1], [0, 0, 1, 1], [], []>} : vector<8x32xbf16>, vector<32x32xbf16>, vector<8x32xf32> -> vector<8x32xf32>
    %66 = vector.extract_strided_slice %5 {offsets = [0, 7, 0], sizes = [8, 1, 1], strides = [1, 1, 1]} : vector<8x8x1xf32> to vector<8x1x1xf32>
    %67 = vector.shape_cast %66 : vector<8x1x1xf32> to vector<8x1xf32>
    %68 = vector.broadcast %67 : vector<8x1xf32> to vector<8x32xf32>
    %69 = arith.mulf %68, %65 : vector<8x32xf32>
    %70 = arith.addf %62, %69 : vector<8x32xf32>
    %c0_30 = arith.constant 0 : index
    %c0_31 = arith.constant 0 : index
    %71 = vector.load %arg8[%c0_30, %c0_31] : memref<8x32xf32, #tpu.memory_space<vmem>>, vector<8x32xf32>
    %72 = arith.addf %71, %70 : vector<8x32xf32>
    %c0_32 = arith.constant 0 : index
    %c0_33 = arith.constant 0 : index
    %73 = vector.load %arg8[%c0_32, %c0_33] : memref<8x32xf32, #tpu.memory_space<vmem>>, vector<8x32xf32>
    tpu.vector_store %arg8[%c0_32, %c0_33], %72 {strides = array<i32>} : memref<8x32xf32, #tpu.memory_space<vmem>>, vector<8x32xf32>,
    %c3_i32 = arith.constant 3 : i32
    %74 = arith.cmpi eq, %arg1, %c3_i32 : i32
    %75 = arith.extui %74 : i1 to i32
    %c0_i32_34 = arith.constant 0 : i32
    %76 = arith.cmpi ne, %75, %c0_i32_34 : i32
    scf.if %76 {
      %c0_35 = arith.constant 0 : index
      %c0_36 = arith.constant 0 : index
      %77 = vector.load %arg8[%c0_35, %c0_36] : memref<8x32xf32, #tpu.memory_space<vmem>>, vector<8x32xf32>
      %c0_37 = arith.constant 0 : index
      %c0_38 = arith.constant 0 : index
      %78 = vector.load %arg5[%c0_37, %c0_38] : memref<1x32xf32, #tpu.memory_space<vmem>>, vector<1x32xf32>
      %79 = vector.broadcast %78 : vector<1x32xf32> to vector<8x32xf32>
      %80 = arith.mulf %77, %79 : vector<8x32xf32>
      %c0_39 = arith.constant 0 : index
      %c0_40 = arith.constant 0 : index
      %81 = vector.load %arg6[%c0_39, %c0_40] : memref<1x32xf32, #tpu.memory_space<vmem>>, vector<1x32xf32>
      %82 = vector.broadcast %81 : vector<1x32xf32> to vector<8x32xf32>
      %83 = arith.addf %80, %82 : vector<8x32xf32>
      %c0_41 = arith.constant 0 : index
      %c0_42 = arith.constant 0 : index
      %84 = vector.load %arg7[%c0_41, %c0_42] : memref<8x32xf32, #tpu.memory_space<vmem>>, vector<8x32xf32>
      tpu.vector_store %arg7[%c0_41, %c0_42], %83 {strides = array<i32>} : memref<8x32xf32, #tpu.memory_space<vmem>>, vector<8x32xf32>,
    } else {
    }
    return
  }
  func.func @transform_0(%arg0: i32, %arg1: i32) -> (i32, i32, i32) {
    %c0_i32 = arith.constant 0 : i32
    %c0_i32_0 = arith.constant 0 : i32
    return %arg0, %arg1, %c0_i32 : i32, i32, i32
  }
  func.func @transform_1(%arg0: i32, %arg1: i32) -> (i32, i32) {
    %c0_i32 = arith.constant 0 : i32
    %c0_i32_0 = arith.constant 0 : i32
    return %arg0, %c0_i32 : i32, i32
  }
  func.func @transform_2(%arg0: i32, %arg1: i32) -> (i32, i32, i32) {
    %c0_i32 = arith.constant 0 : i32
    %c0_i32_0 = arith.constant 0 : i32
    %c0_i32_1 = arith.constant 0 : i32
    return %arg1, %c0_i32, %c0_i32_0 : i32, i32, i32
  }
  func.func @transform_3(%arg0: i32, %arg1: i32) -> (i32, i32) {
    %c0_i32 = arith.constant 0 : i32
    %c0_i32_0 = arith.constant 0 : i32
    %c0_i32_1 = arith.constant 0 : i32
    return %c0_i32, %c0_i32_0 : i32, i32
  }
  func.func @transform_4(%arg0: i32, %arg1: i32) -> (i32, i32) {
    %c0_i32 = arith.constant 0 : i32
    %c0_i32_0 = arith.constant 0 : i32
    %c0_i32_1 = arith.constant 0 : i32
    return %c0_i32, %c0_i32_0 : i32, i32
  }
  func.func @transform_5(%arg0: i32, %arg1: i32) -> (i32, i32) {
    %c0_i32 = arith.constant 0 : i32
    %c0_i32_0 = arith.constant 0 : i32
    return %arg0, %c0_i32 : i32, i32
  }
}

</mosaic_0001>

<bundles_post_ra>
// kernel: tpu_custom_call.1
= control target key start
LH: loop header
LB: loop body
LE: loop exit
PB: predicated region body
PF: predicated region fallthrough
CT: control target
= control target key end

     0   :  { %s2276_s0 = inlined_call_operand.vmem [shape: f32[16,32,1], index: 0, kind: input, shape index: {}]   ;;  %s2277_s1 = inlined_call_operand.vmem [shape: f32[16,32], index: 1, kind: input, shape index: {}]   ;;  %s2278_s2 = inlined_call_operand.vmem [shape: bf16[32,32,32], index: 2, kind: input, shape index: {}]   ;;  %s2279_s3 = inlined_call_operand.vmem [shape: f32[1,32], index: 3, kind: input, shape index: {}]   ;;  %s2280_s4 = inlined_call_operand.vmem [shape: f32[1,32], index: 4, kind: input, shape index: {}]   ;;  %s2281_s5 = inlined_call_operand.hbm [shape: f32[16,32], index: 5, kind: output, shape index: {}]  }
   0x1   :  { %2286 = sst [smem:[#allocation10_spill]] %s2276_s0 }
   0x2   :  { %10 = vsyncpa [#allocation5], 0 }
   0x3   :  { %12 = vsyncpa [#allocation5 + $0x1], 0  ;;  %s1877_s18 = smov 0   ;;  %s1879_s19 = smov 0  }
   0x4   :  { %s1881_s20 = smov 0   ;;  %s1883_s21 = smov 0  }
   0x5   :  { %s1885_s22 = smov 0   ;;  %s1887_s23 = smov 0  }
   0x6   :  { %s1889_s24 = smov 0   ;;  %s1891_s25 = smov 0  }
   0x7   :  { %s1893_s26 = smov 0   ;;  %s1895_s27 = smov 0  }
   0x8 LB: > { %2287 = sst [smem:[#allocation7_spill]] %s1836_s26  ;;  %s1456_s28 = sadd.s32 4294967295, %s1840_s27   ;;  %s1840_s27 = sphi %s1895_s27, %s18_s27   ;;  %s1836_s26 = sphi %s1893_s26, %s2297_s26   ;;  %s1832_s25 = sphi %s1891_s25, %s2304_s25   ;;  %s1828_s24 = sphi %s1889_s24, %s2295_s24   ;;  %s1824_s23 = sphi %s1887_s23, %s2303_s23   ;;  %s1820_s22 = sphi %s1885_s22, %s2302_s22   ;;  %s1816_s21 = sphi %s1883_s21, %s2301_s21   ;;  %s1812_s20 = sphi %s1881_s20, %s2300_s20   ;;  %s1808_s19 = sphi %s1879_s19, %s2299_s19   ;;  %s1804_s18 = sphi %s1877_s18, %s2298_s18  }
   0x9   : > { %s1457_s29 = sadd.s32 4294967294, %s1840_s27   ;;  %s27_s30 = sadd.s32 1, %s1832_s25 }
   0xa   : > { %s30_s6 = sadd.s32 1, %s1836_s26  ;;  %p28_p0 = scmp.ge.s32.totalorder %s27_s30, 4 }
   0xb   : > { %s39_s7 = sadd.s32 1, %s1820_s22  ;;  %p46_p1 = scmp.ne.s32.totalorder %s1820_s22, %s1816_s21 }
   0xc   : > { %p47_p2 = scmp.eq.s32.totalorder %s1840_s27, 0  ;;  %s2306_s30 = smov (%p28_p0, %s27_s30), 0 }
   0xd   : > { %2288 = sst [smem:[#allocation8_spill]] %s2306_s30  ;;  %s2308_s6 = smov (!%p28_p0, %s30_s6), %s1836_s26 }
   0xe   : > { %s35_s8 = ssub.s32 %s1832_s25, %s2306_s30  ;;  %p1940_p3 = por %p47_p2, %p46_p1 }
   0xf   : > { %p32_p4 = scmp.ge.s32.totalorder %s2308_s6, 2  ;;  %s159_s10 = sadd.s32 1, %s1812_s20 }
  0x10   : > { %p169_p5 = scmp.ne.s32.totalorder %s1812_s20, %s1808_s19  ;;  %p170_p6 = scmp.eq.s32.totalorder %s1456_s28, 7 }
  0x11   : > { %s2310_s6 = smov (%p32_p4, %s2308_s6), 0  ;;  %p175_p8 = scmp.ne.s32.totalorder %s1808_s19, %s1804_s18 }
  0x12   : > { %2290 = sst [smem:[#allocation9_spill]] %s2310_s6  ;;  %p1949_p7 = por %p170_p6, %p169_p5 }
  0x13   : > { %s34_s12 = ssub.s32 %s1836_s26, %s2310_s6  ;;  %p176_p9 = scmp.eq.s32.totalorder %s1457_s29, 7 }
  0x14   : > { %s36_s13 = sor.u32 %s35_s8, %s34_s12  ;;  %p157_p10 = scmp.eq.s32.totalorder %s34_s12, 0 }
  0x15   : > { %p37_p11 = scmp.eq.s32.totalorder %s36_s13, 0  ;;  %p1957_p12 = por %p176_p9, %p175_p8 }
  0x16   : > { %s1962_s15 = scalar_select %p157_p10, %s1812_s20, %s159_s10  }
  0x17   : > { %s1965_s16 = scalar_select %p37_p11, %s1820_s22, %s39_s7  }
  0x18   : > { %p1459_p13 = scmp.ge.s32.totalorder %s1840_s27, 8 }
  0x1a   : > { %198 = sbr.rel (%p1459_p13) target bundleno = 51 (0x33), region = 24 }
  0x21   : > { %201 = sbr.rel (!%p1940_p3) target bundleno = 51 (0x33), region = 28  ;;  %s203_s17 = sand.u32 (%p1940_p3), 1, %s1820_s22  }
  0x22   : > { %s1531_s28 = sshll.u32 (%p1940_p3), %s1836_s26, 5  ;;  %s1460_s29 = sshll.u32 (%p1940_p3), %s203_s17, 6 }
  0x23   : > { %s208_s8 = sadd.s32 (%p1940_p3), %s1832_s25, %s1531_s28  ;;  %s2293_s0 = sld [smem:[#allocation10_spill]] (%p1940_p3) }
  0x24   : > { %s1463_s12 = sshll.u32 (%p1940_p3), %s208_s8, 3  ;;  %s205_s7 = scalar_lea.vmem (%p1940_p3), [#allocation3], %s1460_s29 }
  0x29   : > { %s210_s10 = scalar_lea.vmem %s2293_s0, %s1463_s12 }
  0x2a   : > { %v252_v0 = vld [vmem:[%s210_s10] sm:$0xff] }
  0x2b   : > { %v254_v1 = vld [vmem:[%s210_s10 + $0x20] sm:$0xff]  ;;  %253 = vst [vmem:[%s205_s7] sm:$0xff] %v252_v0 }
  0x2c   : > { %v256_v2 = vld [vmem:[%s210_s10 + $0x40] sm:$0xff]  ;;  %255 = vst [vmem:[%s205_s7 + $0x8] sm:$0xff] %v254_v1 }
  0x2d   : > { %257 = vst [vmem:[%s205_s7 + $0x10] sm:$0xff] %v256_v2  ;;  %v258_v3 = vld [vmem:[%s210_s10 + $0x60] sm:$0xff] }
  0x2e   : > { %v260_v4 = vld [vmem:[%s210_s10 + $0x80] sm:$0xff]  ;;  %259 = vst [vmem:[%s205_s7 + $0x18] sm:$0xff] %v258_v3 }
  0x2f   : > { %v262_v5 = vld [vmem:[%s210_s10 + $0xa0] sm:$0xff]  ;;  %261 = vst [vmem:[%s205_s7 + $0x20] sm:$0xff] %v260_v4 }
  0x30   : > { %263 = vst [vmem:[%s205_s7 + $0x28] sm:$0xff] %v262_v5  ;;  %v264_v6 = vld [vmem:[%s210_s10 + $0xc0] sm:$0xff] }
  0x31   : > { %v266_v7 = vld [vmem:[%s210_s10 + $0xe0] sm:$0xff]  ;;  %265 = vst [vmem:[%s205_s7 + $0x30] sm:$0xff] %v264_v6 }
  0x32   : > { %267 = vst [vmem:[%s205_s7 + $0x38] sm:$0xff] %v266_v7 }
  0x33 PF: > { %p1464_p0 = scmp.ge.s32.totalorder %s1840_s27, 1  ;;  %p289_p1 = scmp.lt.s32.totalorder %s1840_s27, 9 }
  0x35   : > { %p290_p2 = pnand %p1464_p0, %p289_p1 }
  0x36   : > { %s296_s6 = sand.u32 (!%p290_p2), 1, %s1816_s21   ;;  %s2285_s9 = sand.u32 (!%p290_p2), 1, %s1808_s19  }
  0x37   : > { %293 = sbr.rel (%p290_p2) target bundleno = 398 (0x18e), region = 74  ;;  %s1465_s17 = sshll.u32 (!%p290_p2), %s296_s6, 6 }
  0x38   : > { %s1982_s28 = sshll.u32 (!%p290_p2), %s2285_s9, 3  ;;  %p334_p3 = scmp.lt.s32.totalorder (!%p290_p2), %s1828_s24, 1 }
  0x39   : > { %s1468_s29 = sshll.u32 (!%p290_p2), %s1824_s23, 3  ;;  %s1995_s6 = scalar_lea.vmem (!%p290_p2), [#allocation3], %s1465_s17 }
  0x3a   : > { %p339_p4 = scmp.lt.s32.totalorder (!%p290_p2), %s1468_s29, 31  ;;  %s332_s9 = scalar_lea.vmem (!%p290_p2), [#allocation4], %s1982_s28 }
  0x3b   : > { %p1471_p5 = scmp.ne.s32.totalorder (!%p290_p2), %s1824_s23, 0 }
  0x3e   : > { %s335_s8 = scalar_select %p334_p3, %s1828_s24, 1 }
  0x3f   : > { %s2312_s29 = smov (!%p339_p4, %s1468_s29), 31  ;;  %349 = sbr.rel (%p1471_p5) target bundleno = 70 (0x46), region = 82 }
  0x40   : > { %s1467_s12 = sshll.u32 %s335_s8, 3  ;;  %s1532_s0 = sshll.u32 %s2312_s29, 4  ;;  %vm350_vm0 = vcmask (!%p1471_p5), 261120   ;;  %v1842_v8 = vmov (!%p1471_p5), 0.0  }
  0x41   : > { %s337_s7 = scalar_lea.vmem %s2277_s1, %s1467_s12  ;;  %s1993_s21 = scalar_lea.vmem %s2278_s2, %s1532_s0  ;;  %351 = vst.msk [vmem:[#allocation2] sm:$0xff] (!%p1471_p5), %vm350_vm0, %v1842_v8 }
  0x46 PF: > { %v1714_v9 = vld [vmem:[%s1993_s21] sm:$0xff]   ;;  %v1843_v10 = vmov 0.0   ;;  %v1715_v11 = vld [vmem:[%s1993_s21 + $0x10] sm:$0xff]   ;;  %v1716_v12 = vld [vmem:[%s1993_s21 + $0x8] sm:$0xff]   ;;  %vm1844_vm1 = vmmov 0   ;;  %v1845_v16 = vmov 0  }
  0x47   : > { %1557 = vmatprep.subr.bf16.mxu0 %v1843_v10  ;;  %1565 = vmatprep.subr.bf16.mxu1 %v1843_v10  ;;  %v1717_v13 = vld [vmem:[%s1993_s21 + $0x18] sm:$0xff]   ;;  %v352_v14 = vld [vmem:[%s337_s7] sm:$0xff]  ;;  %vm378_vm2 = vcmask 261120   ;;  %v1719_v18 = vld [vmem:[%s1993_s21 + $0x30] sm:$0xff]   ;;  %vm1295_vm3 = vcmask 1041409   ;;  %vm1298_vm4 = vcmask 1042434  }
  0x48   : > { %1558 = vmatpush3.bf16.msra.mxu0 %v1714_v9  ;;  %1561 = vmatprep.mubr.msk.bf16.mxu0 %vm1844_vm1, %v1843_v10  ;;  %v2011_v15 = vpack.c.bf16 %v352_v14, %v352_v14  ;;  %v1718_v17 = vld [vmem:[%s1993_s21 + $0x20] sm:$0xff]   ;;  %v1720_v19 = vld [vmem:[%s1993_s21 + $0x28] sm:$0xff]   ;;  %v1721_v20 = vld [vmem:[%s1993_s21 + $0x38] sm:$0xff]   ;;  %vm1301_vm5 = vcmask 1043459   ;;  %vm1304_vm6 = vcmask 1044484   ;;  %vm1307_vm7 = vcmask 1045509  }
  0x49   : > { %1566 = vmatpush3.bf16.msra.mxu1 %v1715_v11  ;;  %1559 = vmatprep.subr.bf16.mxu0 %v1843_v10  ;;  %v1722_v21 = vld [vmem:[%s1993_s21 + $0x40] sm:$0xff]   ;;  %v1723_v22 = vld [vmem:[%s1993_s21 + $0x50] sm:$0xff]   ;;  %v1724_v24 = vld [vmem:[%s1993_s21 + $0x48] sm:$0xff]   ;;  %vm1310_vm8 = vcmask 1046534   ;;  %vm1313_vm9 = vcmask 1047559   ;;  %p1524_p6 = scmp.ne.s32.totalorder %s1824_s23, 3 }
  0x4a   : > { %1567 = vmatprep.subr.bf16.mxu1 %v1843_v10  ;;  %1569 = vmatprep.mubr.msk.bf16.mxu1 %vm1844_vm1, %v1843_v10  ;;  %v355_v23 = vld [vmem:[%s1995_s6 + $0x8] sm:$0xff]  ;;  %v354_v25 = vld [vmem:[%s1995_s6] sm:$0xff]  ;;  %v1725_v26 = vld [vmem:[%s1993_s21 + $0x58] sm:$0xff]  }
  0x4b   : > { %1713 = vset.pattern.permute.xlu1 %v1845_v16  ;;  %1712 = vset.pattern.permute.xlu0 %v1845_v16  ;;  %v356_v27 = vld [vmem:[%s1995_s6 + $0x10] sm:$0xff]  ;;  %v1726_v28 = vld [vmem:[%s1993_s21 + $0x60] sm:$0xff]   ;;  %v1727_v30 = vld [vmem:[%s1993_s21 + $0x70] sm:$0xff]  }
  0x4c   : > { %1560 = vmatpush3.bf16.msra.mxu0 %v1716_v12  ;;  %429 = vperm.xlu0 %1712, %v355_v23   ;;  %v357_v29 = vld [vmem:[%s1995_s6 + $0x18] sm:$0xff]  ;;  %v1728_v31 = vld [vmem:[%s1993_s21 + $0x68] sm:$0xff]   ;;  %v1729_v33 = vld [vmem:[%s1993_s21 + $0x78] sm:$0xff]  }
  0x4d   : > { %1568 = vmatpush3.bf16.msra.mxu1 %v1717_v13  ;;  %1573 = vmatprep.subr.bf16.mxu0 %v1843_v10  ;;  %v358_v32 = vld [vmem:[%s1995_s6 + $0x20] sm:$0xff]  ;;  %v359_v34 = vld [vmem:[%s1995_s6 + $0x28] sm:$0xff]  ;;  %v360_v35 = vld [vmem:[%s1995_s6 + $0x30] sm:$0xff] }
  0x4e   : > { %1581 = vmatprep.subr.bf16.mxu1 %v1843_v10  ;;  %424 = vperm.xlu1 %1713, %v354_v25   ;;  %v361_v36 = vld [vmem:[%s1995_s6 + $0x38] sm:$0xff] }
  0x4f   : > { %1562 = vmatmul.mubr.msk.bf16.vlgmr.msra.gmra.mrb[0].mxu0 %vm378_vm2, %v2011_v15 }
  0x50   : > { %1570 = vmatmul.mubr.msk.bf16.vlgmr.msra.gmra.mrb[0].mxu1 %vm378_vm2, %v2011_v15  ;;  %1574 = vmatpush3.bf16.msra.mxu0 %v1718_v17 }
  0x51   : > { %1582 = vmatpush3.bf16.msra.mxu1 %v1719_v18  ;;  %1575 = vmatprep.subr.bf16.mxu0 %v1843_v10 }
  0x52   : > { %1583 = vmatprep.subr.bf16.mxu1 %v1843_v10  ;;  %1577 = vmatprep.mubr.msk.bf16.mxu0 %vm1844_vm1, %v1843_v10 }
  0x53   : > { %1585 = vmatprep.mubr.msk.bf16.mxu1 %vm1844_vm1, %v1843_v10  ;;  %434 = vperm.xlu0 %1712, %v356_v27  }
  0x54   : > { %1576 = vmatpush3.bf16.msra.mxu0 %v1720_v19  ;;  %439 = vperm.xlu1 %1713, %v357_v29  }
  0x55   : > { %1584 = vmatpush3.bf16.msra.mxu1 %v1721_v20  ;;  %1589 = vmatprep.subr.bf16.mxu0 %v1843_v10 }
  0x56   : > { %1597 = vmatprep.subr.bf16.mxu1 %v1843_v10 }
  0x57   : > { %1578 = vmatmul.mubr.msk.bf16.vlgmr.msra.gmra.mrb[4].mxu0 %vm378_vm2, %v2011_v15  ;;  %444 = vperm.xlu0 %1712, %v358_v32  }
  0x58   : > { %1586 = vmatmul.mubr.msk.bf16.vlgmr.msra.gmra.mrb[4].mxu1 %vm378_vm2, %v2011_v15  ;;  %1590 = vmatpush3.bf16.msra.mxu0 %v1722_v21 }
  0x59   : > { %1598 = vmatpush3.bf16.msra.mxu1 %v1723_v22  ;;  %1591 = vmatprep.subr.bf16.mxu0 %v1843_v10 }
  0x5a   : > { %1599 = vmatprep.subr.bf16.mxu1 %v1843_v10  ;;  %1593 = vmatprep.mubr.msk.bf16.mxu0 %vm1844_vm1, %v1843_v10 }
  0x5b   : > { %1601 = vmatprep.mubr.msk.bf16.mxu1 %vm1844_vm1, %v1843_v10  ;;  %449 = vperm.xlu1 %1713, %v359_v34  }
  0x5c   : > { %1592 = vmatpush3.bf16.msra.mxu0 %v1724_v24  ;;  %454 = vperm.xlu0 %1712, %v360_v35  }
  0x5d   : > { %1600 = vmatpush3.bf16.msra.mxu1 %v1725_v26  ;;  %1605 = vmatprep.subr.bf16.mxu0 %v1843_v10 }
  0x5e   : > { %1613 = vmatprep.subr.bf16.mxu1 %v1843_v10 }
  0x5f   : > { %1594 = vmatmul.mubr.msk.bf16.vlgmr.msra.gmra.mrb[8].mxu0 %vm378_vm2, %v2011_v15  ;;  %459 = vperm.xlu1 %1713, %v361_v36  }
  0x60   : > { %1602 = vmatmul.mubr.msk.bf16.vlgmr.msra.gmra.mrb[8].mxu1 %vm378_vm2, %v2011_v15  ;;  %1606 = vmatpush3.bf16.msra.mxu0 %v1726_v28 }
  0x61   : > { %1614 = vmatpush3.bf16.msra.mxu1 %v1727_v30  ;;  %1607 = vmatprep.subr.bf16.mxu0 %v1843_v10 }
  0x62   : > { %1615 = vmatprep.subr.bf16.mxu1 %v1843_v10  ;;  %1609 = vmatprep.mubr.msk.bf16.mxu0 %vm1844_vm1, %v1843_v10 }
  0x63   : > { %1617 = vmatprep.mubr.msk.bf16.mxu1 %vm1844_vm1, %v1843_v10 }
  0x64   : > { %1608 = vmatpush3.bf16.msra.mxu0 %v1728_v31 }
  0x65   : > { %1616 = vmatpush3.bf16.msra.mxu1 %v1729_v33 }
  0x67   : > { %1610 = vmatmul.mubr.msk.bf16.vlgmr.msra.gmra.mrb[12].mxu0 %vm378_vm2, %v2011_v15 }
  0x68   : > { %1618 = vmatmul.mubr.msk.bf16.vlgmr.msra.gmra.mrb[12].mxu1 %vm378_vm2, %v2011_v15 }
  0xcb   : > { %v2073_v37 = vpop.permute.xlu0 %429 }
  0xcd   : > { %v2075_v38 = vpop.permute.xlu1 %424 }
  0xd2   : > { %v2077_v39 = vpop.permute.xlu0 %434 }
  0xd3   : > { %v2079_v40 = vpop.permute.xlu1 %439 }
  0xd6   : > { %v2081_v41 = vpop.permute.xlu0 %444 }
  0xda   : > { %v2083_v42 = vpop.permute.xlu1 %449 }
  0xdb   : > { %v2091_v2 = vpop.permute.xlu0 %454 }
  0xde   : > { %v2101_v20 = vpop.permute.xlu1 %459 }
 0x122   : > { %v416_v43 = vpop.f32.mrb[0].mxu0 }
 0x123   : > { %v463_v44 = vrot.slane %v416_v43, 1  ;;  %v464_v45 = vrot.slane %v416_v43, 2  ;;  %v465_v46 = vrot.slane %v416_v43, 3  ;;  %v466_v47 = vrot.slane %v416_v43, 4  ;;  %v545_v48 = vpop.f32.mrb[0].mxu1  ;;  %v1563_v49 = vpop.f32.mrb[1].mxu0 }
 0x124   : > { %v467_v50 = vrot.slane %v416_v43, 5  ;;  %v478_v51 = vmul.f32 %v2075_v38, %v416_v43  ;;  %v552_v52 = vrot.slane %v545_v48, 7  ;;  %v553_v53 = vrot.slane %v545_v48, 1  ;;  %v1571_v54 = vpop.f32.mrb[1].mxu1  ;;  %v419_v55 = vpop.f32.mrb[2].mxu0 }
 0x125   : > { %v479_v56 = vmul.f32 %v463_v44, %v2073_v37  ;;  %v480_v57 = vmul.f32 %v464_v45, %v2077_v39  ;;  %v481_v58 = vmul.f32 %v465_v46, %v2079_v40  ;;  %v482_v59 = vmul.f32 %v466_v47, %v2081_v41  ;;  %v548_v60 = vpop.f32.mrb[2].mxu1  ;;  %v1564_v61 = vpop.f32.mrb[3].mxu0 }
 0x126   : > { %v483_v62 = vmul.f32 %v467_v50, %v2083_v42  ;;  %v554_v63 = vrot.slane %v545_v48, 2  ;;  %v555_v0 = vrot.slane %v545_v48, 3  ;;  %v556_v1 = vrot.slane %v545_v48, 4  ;;  %v1572_v3 = vpop.f32.mrb[3].mxu1 }
 0x127   : > { %v567_v4 = vmul.f32 %v552_v52, %v2075_v38  ;;  %v568_v5 = vmul.f32 %v545_v48, %v2073_v37  ;;  %v569_v6 = vmul.f32 %v553_v53, %v2077_v39  ;;  %v468_v7 = vrot.slane %v416_v43, 6 }
 0x128   : > { %v570_v8 = vmul.f32 %v554_v63, %v2079_v40  ;;  %v571_v9 = vmul.f32 %v555_v0, %v2081_v41  ;;  %v572_v10 = vmul.f32 %v556_v1, %v2083_v42  ;;  %v557_v11 = vrot.slane %v545_v48, 5 }
 0x129   : > { %v583_v12 = vrot.slane %v567_v4, 1  ;;  %v584_v13 = vrot.slane %v568_v5, 1  ;;  %v585_v14 = vrot.slane %v569_v6, 1  ;;  %v484_v15 = vmul.f32 %v468_v7, %v2091_v2 }
 0x12a   : > { %v586_v16 = vrot.slane %v570_v8, 1  ;;  %v587_v17 = vrot.slane %v571_v9, 1  ;;  %v588_v18 = vrot.slane %v572_v10, 1  ;;  %v573_v19 = vmul.f32 %v557_v11, %v2091_v2  ;;  %v658_v21 = vpop.f32.mrb[4].mxu0 }
 0x12b   : > { %v599_v22 = vadd.f32 %v583_v12, %v478_v51  ;;  %v600_v23 = vadd.f32 %v584_v13, %v479_v56  ;;  %v469_v24 = vrot.slane %v416_v43, 7  ;;  %v558_v25 = vrot.slane %v545_v48, 6  ;;  %v2103_v26 = vpop.f32.mrb[4].mxu1  ;;  %v1579_v27 = vpop.f32.mrb[5].mxu0 }
 0x12c   : > { %v602_v28 = vadd.f32 %v586_v16, %v481_v58  ;;  %v603_v29 = vadd.f32 %v587_v17, %v482_v59  ;;  %v604_v30 = vadd.f32 %v588_v18, %v483_v62  ;;  %v589_v31 = vrot.slane %v573_v19, 1  ;;  %v1587_v32 = vpop.f32.mrb[5].mxu1  ;;  %v661_v33 = vpop.f32.mrb[6].mxu0 }
 0x12d   : > { %v485_v34 = vmul.f32 %v469_v24, %v2101_v20  ;;  %v574_v35 = vmul.f32 %v558_v25, %v2101_v20  ;;  %v601_v36 = vadd.f32 %v585_v14, %v480_v57  ;;  %v665_v44 = vrot.slane %v658_v21, 6  ;;  %v774_v45 = vpop.f32.mrb[6].mxu1  ;;  %v1580_v46 = vpop.f32.mrb[7].mxu0 }
 0x12e   : > { %v605_v47 = vadd.f32 %v589_v31, %v484_v15  ;;  %v666_v43 = vrot.slane %v658_v21, 7  ;;  %v667_v48 = vrot.slane %v658_v21, 1  ;;  %v668_v49 = vrot.slane %v658_v21, 2  ;;  %v1588_v50 = vpop.f32.mrb[7].mxu1 }
 0x12f   : > { %v590_v51 = vrot.slane %v574_v35, 1  ;;  %v669_v52 = vrot.slane %v658_v21, 3  ;;  %v670_v53 = vrot.slane %v658_v21, 4  ;;  %v671_v54 = vrot.slane %v658_v21, 5 }
 0x130   : > { %v680_v55 = vmul.f32 %v665_v44, %v2075_v38  ;;  %v681_v56 = vmul.f32 %v666_v43, %v2073_v37  ;;  %v682_v58 = vmul.f32 %v658_v21, %v2077_v39  ;;  %v683_v57 = vmul.f32 %v667_v48, %v2079_v40 }
 0x131   : > { %v606_v59 = vadd.f32 %v590_v51, %v485_v34  ;;  %v684_v60 = vmul.f32 %v668_v49, %v2081_v41  ;;  %v685_v61 = vmul.f32 %v669_v52, %v2083_v42  ;;  %v686_v62 = vmul.f32 %v670_v53, %v2091_v2 }
 0x132   : > { %v687_v63 = vmul.f32 %v671_v54, %v2101_v20  ;;  %v696_v0 = vrot.slane %v680_v55, 2  ;;  %v697_v1 = vrot.slane %v681_v56, 2  ;;  %v698_v3 = vrot.slane %v682_v58, 2  ;;  %v2115_v4 = vpop.f32.mrb[8].mxu0 }
 0x133   : > { %v699_v5 = vrot.slane %v683_v57, 2  ;;  %v700_v6 = vrot.slane %v684_v60, 2  ;;  %v701_v7 = vrot.slane %v685_v61, 2  ;;  %v702_v8 = vrot.slane %v686_v62, 2  ;;  %v2117_v9 = vpop.f32.mrb[8].mxu1  ;;  %v1595_v10 = vpop.f32.mrb[9].mxu0 }
 0x134   : > { %v703_v11 = vrot.slane %v687_v63, 2  ;;  %v712_v12 = vadd.f32 %v696_v0, %v599_v22  ;;  %v713_v13 = vadd.f32 %v697_v1, %v600_v23  ;;  %v714_v14 = vadd.f32 %v698_v3, %v601_v36  ;;  %v1603_v15 = vpop.f32.mrb[9].mxu1  ;;  %v887_v16 = vpop.f32.mrb[10].mxu0 }
 0x135   : > { %v716_v17 = vadd.f32 %v700_v6, %v603_v29  ;;  %v717_v18 = vadd.f32 %v701_v7, %v604_v30  ;;  %v718_v19 = vadd.f32 %v702_v8, %v605_v47  ;;  %v715_v21 = vadd.f32 %v699_v5, %v602_v28  ;;  %v1000_v24 = vpop.f32.mrb[10].mxu1  ;;  %v1596_v25 = vpop.f32.mrb[11].mxu0 }
 0x136   : > { %v719_v27 = vadd.f32 %v703_v11, %v606_v59  ;;  %v778_v31 = vrot.slane %v2103_v26, 5  ;;  %v779_v32 = vrot.slane %v2103_v26, 6  ;;  %v780_v33 = vrot.slane %v2103_v26, 7  ;;  %v1604_v34 = vpop.f32.mrb[11].mxu1 }
 0x137   : > { %v781_v22 = vrot.slane %v2103_v26, 1  ;;  %v782_v23 = vrot.slane %v2103_v26, 2  ;;  %v783_v35 = vrot.slane %v2103_v26, 3  ;;  %v784_v29 = vrot.slane %v2103_v26, 4 }
 0x138   : > { %v793_v28 = vmul.f32 %v778_v31, %v2075_v38  ;;  %v794_v30 = vmul.f32 %v779_v32, %v2073_v37  ;;  %v795_v36 = vmul.f32 %v780_v33, %v2077_v39  ;;  %v796_v44 = vmul.f32 %v2103_v26, %v2079_v40 }
 0x139   : > { %v797_v45 = vmul.f32 %v781_v22, %v2081_v41  ;;  %v798_v46 = vmul.f32 %v782_v23, %v2083_v42  ;;  %v799_v47 = vmul.f32 %v783_v35, %v2091_v2  ;;  %v800_v43 = vmul.f32 %v784_v29, %v2101_v20 }
 0x13a   : > { %v809_v48 = vrot.slane %v793_v28, 3  ;;  %v810_v49 = vrot.slane %v794_v30, 3  ;;  %v811_v50 = vrot.slane %v795_v36, 3  ;;  %v812_v51 = vrot.slane %v796_v44, 3  ;;  %v2135_v52 = vpop.f32.mrb[12].mxu0 }
 0x13b   : > { %v813_v53 = vrot.slane %v797_v45, 3  ;;  %v814_v54 = vrot.slane %v798_v46, 3  ;;  %v815_v55 = vrot.slane %v799_v47, 3  ;;  %v816_v56 = vrot.slane %v800_v43, 3  ;;  %v2137_v58 = vpop.f32.mrb[12].mxu1  ;;  %v1611_v26 = vpop.f32.mrb[13].mxu0 }
 0x13c   : > { %v825_v57 = vadd.f32 %v809_v48, %v712_v12  ;;  %v826_v59 = vadd.f32 %v810_v49, %v713_v13  ;;  %v827_v60 = vadd.f32 %v811_v50, %v714_v14  ;;  %v828_v61 = vadd.f32 %v812_v51, %v715_v21  ;;  %v1619_v62 = vpop.f32.mrb[13].mxu1  ;;  %v1113_v63 = vpop.f32.mrb[14].mxu0 }
 0x13d   : > { %v830_v0 = vadd.f32 %v814_v54, %v717_v18  ;;  %v831_v1 = vadd.f32 %v815_v55, %v718_v19  ;;  %v832_v3 = vadd.f32 %v816_v56, %v719_v27  ;;  %v829_v5 = vadd.f32 %v813_v53, %v716_v17  ;;  %v1226_v6 = vpop.f32.mrb[14].mxu1  ;;  %v1612_v7 = vpop.f32.mrb[15].mxu0 }
 0x13e   : > { %v891_v8 = vrot.slane %v2115_v4, 4  ;;  %v892_v10 = vrot.slane %v2115_v4, 5  ;;  %v893_v11 = vrot.slane %v2115_v4, 6  ;;  %v894_v15 = vrot.slane %v2115_v4, 7  ;;  %v1620_v12 = vpop.f32.mrb[15].mxu1 }
 0x13f   : > { %v895_v13 = vrot.slane %v2115_v4, 1  ;;  %v896_v14 = vrot.slane %v2115_v4, 2  ;;  %v897_v16 = vrot.slane %v2115_v4, 3  ;;  %v910_v17 = vmul.f32 %v2115_v4, %v2081_v41 }
 0x140   : > { %v906_v18 = vmul.f32 %v891_v8, %v2075_v38  ;;  %v907_v19 = vmul.f32 %v892_v10, %v2073_v37  ;;  %v908_v21 = vmul.f32 %v893_v11, %v2077_v39  ;;  %v909_v24 = vmul.f32 %v894_v15, %v2079_v40 }
 0x141   : > { %v911_v25 = vmul.f32 %v895_v13, %v2083_v42  ;;  %v912_v27 = vmul.f32 %v896_v14, %v2091_v2  ;;  %v913_v31 = vmul.f32 %v897_v16, %v2101_v20  ;;  %v926_v32 = vrot.slane %v910_v17, 4 }
 0x142   : > { %v922_v33 = vrot.slane %v906_v18, 4  ;;  %v923_v34 = vrot.slane %v907_v19, 4  ;;  %v924_v22 = vrot.slane %v908_v21, 4  ;;  %v925_v23 = vrot.slane %v909_v24, 4 }
 0x143   : > { %v927_v4 = vrot.slane %v911_v25, 4  ;;  %v928_v35 = vrot.slane %v912_v27, 4  ;;  %v929_v29 = vrot.slane %v913_v31, 4  ;;  %v942_v28 = vadd.f32 %v926_v32, %v829_v5 }
 0x144   : > { %v938_v30 = vadd.f32 %v922_v33, %v825_v57  ;;  %v939_v36 = vadd.f32 %v923_v34, %v826_v59  ;;  %v940_v44 = vadd.f32 %v924_v22, %v827_v60  ;;  %v941_v45 = vadd.f32 %v925_v23, %v828_v61 }
 0x145   : > { %v944_v46 = vadd.f32 %v928_v35, %v831_v1  ;;  %v945_v47 = vadd.f32 %v929_v29, %v832_v3  ;;  %v943_v43 = vadd.f32 %v927_v4, %v830_v0  ;;  %v1004_v48 = vrot.slane %v2117_v9, 3 }
 0x146   : > { %v1005_v49 = vrot.slane %v2117_v9, 4  ;;  %v1006_v50 = vrot.slane %v2117_v9, 5  ;;  %v1007_v51 = vrot.slane %v2117_v9, 6  ;;  %v1008_v53 = vrot.slane %v2117_v9, 7 }
 0x147   : > { %v1009_v54 = vrot.slane %v2117_v9, 1  ;;  %v1010_v55 = vrot.slane %v2117_v9, 2  ;;  %v1019_v56 = vmul.f32 %v1004_v48, %v2075_v38  ;;  %v1024_v26 = vmul.f32 %v2117_v9, %v2083_v42 }
 0x148   : > { %v1020_v57 = vmul.f32 %v1005_v49, %v2073_v37  ;;  %v1021_v59 = vmul.f32 %v1006_v50, %v2077_v39  ;;  %v1022_v60 = vmul.f32 %v1007_v51, %v2079_v40  ;;  %v1023_v61 = vmul.f32 %v1008_v53, %v2081_v41 }
 0x149   : > { %v1025_v62 = vmul.f32 %v1009_v54, %v2091_v2  ;;  %v1026_v63 = vmul.f32 %v1010_v55, %v2101_v20  ;;  %v1035_v0 = vrot.slane %v1019_v56, 5  ;;  %v1040_v1 = vrot.slane %v1024_v26, 5 }
 0x14a   : > { %v1036_v3 = vrot.slane %v1020_v57, 5  ;;  %v1037_v5 = vrot.slane %v1021_v59, 5  ;;  %v1038_v6 = vrot.slane %v1022_v60, 5  ;;  %v1039_v7 = vrot.slane %v1023_v61, 5 }
 0x14b   : > { %v1041_v8 = vrot.slane %v1025_v62, 5  ;;  %v1042_v9 = vrot.slane %v1026_v63, 5  ;;  %v1051_v10 = vadd.f32 %v1035_v0, %v938_v30  ;;  %v1056_v11 = vadd.f32 %v1040_v1, %v943_v43 }
 0x14c   : > { %v1052_v15 = vadd.f32 %v1036_v3, %v939_v36  ;;  %v1053_v12 = vadd.f32 %v1037_v5, %v940_v44  ;;  %v1054_v13 = vadd.f32 %v1038_v6, %v941_v45  ;;  %v1055_v14 = vadd.f32 %v1039_v7, %v942_v28 }
 0x14d   : > { %v1058_v16 = vadd.f32 %v1042_v9, %v945_v47  ;;  %v1057_v17 = vadd.f32 %v1041_v8, %v944_v46  ;;  %v1117_v18 = vrot.slane %v2135_v52, 2  ;;  %v1118_v19 = vrot.slane %v2135_v52, 3 }
 0x14e   : > { %v1119_v21 = vrot.slane %v2135_v52, 4  ;;  %v1120_v24 = vrot.slane %v2135_v52, 5  ;;  %v1121_v25 = vrot.slane %v2135_v52, 6  ;;  %v1122_v27 = vrot.slane %v2135_v52, 7 }
 0x14f   : > { %v1123_v31 = vrot.slane %v2135_v52, 1  ;;  %v1132_v32 = vmul.f32 %v1117_v18, %v2075_v38  ;;  %v1133_v33 = vmul.f32 %v1118_v19, %v2073_v37  ;;  %v1138_v34 = vmul.f32 %v2135_v52, %v2091_v2 }
 0x150   : > { %v1134_v22 = vmul.f32 %v1119_v21, %v2077_v39  ;;  %v1135_v23 = vmul.f32 %v1120_v24, %v2079_v40  ;;  %v1136_v4 = vmul.f32 %v1121_v25, %v2081_v41  ;;  %v1137_v35 = vmul.f32 %v1122_v27, %v2083_v42 }
 0x151   : > { %v1139_v29 = vmul.f32 %v1123_v31, %v2101_v20  ;;  %v1148_v28 = vrot.slane %v1132_v32, 6  ;;  %v1149_v30 = vrot.slane %v1133_v33, 6  ;;  %v1154_v36 = vrot.slane %v1138_v34, 6  ;;  %v1285_v33 = vld [vmem:[#allocation2] sm:$0xff] }
 0x152   : > { %v1150_v44 = vrot.slane %v1134_v22, 6  ;;  %v1151_v45 = vrot.slane %v1135_v23, 6  ;;  %v1152_v46 = vrot.slane %v1136_v4, 6  ;;  %v1153_v47 = vrot.slane %v1137_v35, 6 }
 0x153   : > { %v1155_v43 = vrot.slane %v1139_v29, 6  ;;  %v1164_v48 = vadd.f32 %v1148_v28, %v1051_v10  ;;  %v1165_v52 = vadd.f32 %v1149_v30, %v1052_v15  ;;  %v1170_v49 = vadd.f32 %v1154_v36, %v1057_v17  ;;  %v1525_v28 = vld [vmem:[%s2279_s3] ss:$0 sm:$0xff] (!%p1524_p6) }
 0x154   : > { %v1166_v50 = vadd.f32 %v1150_v44, %v1053_v12  ;;  %v1167_v51 = vadd.f32 %v1151_v45, %v1054_v13  ;;  %v1168_v53 = vadd.f32 %v1152_v46, %v1055_v14  ;;  %v1169_v54 = vadd.f32 %v1153_v47, %v1056_v11  ;;  %v1526_v30 = vld [vmem:[%s2280_s4] ss:$0 sm:$0xff] (!%p1524_p6) }
 0x155   : > { %v1171_v55 = vadd.f32 %v1155_v43, %v1058_v16  ;;  %v1230_v56 = vrot.slane %v2137_v58, 1  ;;  %v1231_v26 = vrot.slane %v2137_v58, 2  ;;  %v1232_v57 = vrot.slane %v2137_v58, 3 }
 0x156   : > { %v1233_v59 = vrot.slane %v2137_v58, 4  ;;  %v1234_v60 = vrot.slane %v2137_v58, 5  ;;  %v1235_v61 = vrot.slane %v2137_v58, 6  ;;  %v1236_v62 = vrot.slane %v2137_v58, 7 }
 0x157   : > { %v1245_v63 = vmul.f32 %v1230_v56, %v2075_v38  ;;  %v1246_v0 = vmul.f32 %v1231_v26, %v2073_v37  ;;  %v1247_v1 = vmul.f32 %v1232_v57, %v2077_v39  ;;  %v1252_v3 = vmul.f32 %v2137_v58, %v2101_v20 }
 0x158   : > { %v1248_v5 = vmul.f32 %v1233_v59, %v2079_v40  ;;  %v1249_v6 = vmul.f32 %v1234_v60, %v2081_v41  ;;  %v1250_v7 = vmul.f32 %v1235_v61, %v2083_v42  ;;  %v1251_v8 = vmul.f32 %v1236_v62, %v2091_v2 }
 0x159   : > { %v1261_v9 = vrot.slane %v1245_v63, 7  ;;  %v1262_v10 = vrot.slane %v1246_v0, 7  ;;  %v1263_v11 = vrot.slane %v1247_v1, 7  ;;  %v1268_v15 = vrot.slane %v1252_v3, 7 }
 0x15a   : > { %v1264_v38 = vrot.slane %v1248_v5, 7  ;;  %v1265_v12 = vrot.slane %v1249_v6, 7  ;;  %v1266_v37 = vrot.slane %v1250_v7, 7  ;;  %v1267_v13 = vrot.slane %v1251_v8, 7 }
 0x15b   : > { %v1277_v39 = vadd.f32 %v1261_v9, %v1164_v48  ;;  %v1278_v14 = vadd.f32 %v1262_v10, %v1165_v52  ;;  %v1279_v16 = vadd.f32 %v1263_v11, %v1166_v50  ;;  %v1284_v20 = vadd.f32 %v1268_v15, %v1171_v55 }
 0x15c   : > { %v1280_v58 = vadd.f32 %v1264_v38, %v1167_v51  ;;  %v1281_v40 = vadd.f32 %v1265_v12, %v1168_v53  ;;  %v1282_v17 = vadd.f32 %v1266_v37, %v1169_v54  ;;  %v1283_v41 = vadd.f32 %v1267_v13, %v1170_v49 }
 0x15d   : > { %v1294_v18 = vrot.slane %v1278_v14, 7  ;;  %v1297_v42 = vrot.slane %v1279_v16, 6  ;;  %v1312_v22 = vrot.slane %v1284_v20, 1 }
 0x15e   : > { %v1300_v19 = vrot.slane %v1280_v58, 5  ;;  %v1303_v24 = vrot.slane %v1281_v40, 4  ;;  %v1306_v27 = vrot.slane %v1282_v17, 3  ;;  %v1309_v32 = vrot.slane %v1283_v41, 2 }
 0x15f   : > { %v1296_v2 = vsel %vm1295_vm3, %v1294_v18, %v1277_v39 }
 0x160   : > { %v1299_v21 = vsel %vm1298_vm4, %v1297_v42, %v1296_v2 }
 0x161   : > { %v1302_v25 = vsel %vm1301_vm5, %v1300_v19, %v1299_v21 }
 0x162   : > { %v1305_v31 = vsel %vm1304_vm6, %v1303_v24, %v1302_v25  ;;  %1321 = sbr.rel (%p1524_p6) target bundleno = 373 (0x175), region = 86 }
 0x163   : > { %v1308_v34 = vsel %vm1307_vm7, %v1306_v27, %v1305_v31 }
 0x164   : > { %v1311_v23 = vsel %vm1310_vm8, %v1309_v32, %v1308_v34 }
 0x165   : > { %v1314_v4 = vsel %vm1313_vm9, %v1312_v22, %v1311_v23 }
 0x166   : > { %v1316_v35 = vadd.f32 %v1314_v4, %v1285_v33 }
 0x168   : > { %1317 = vst.msk [vmem:[#allocation2] sm:$0xff] %vm378_vm2, %v1316_v35 }
 0x16f   : > { %v1322_v29 = vld [vmem:[#allocation2] sm:$0xff] }
 0x170   : > { %v1330_v36 = vmul.f32 %v1525_v28, %v1322_v29 }
 0x172   : > { %v1338_v44 = vadd.f32 %v1526_v30, %v1330_v36 }
 0x174   : > { %1339 = vst.msk [vmem:[%s332_s9] sm:$0xff] %vm378_vm2, %v1338_v44 }
 0x175 PF: > { %s1528_s23 = sshll.u32 %s1828_s24, 7  ;;  %s1354_s13 = sshll.u32 %s332_s9, 4  ;;  %s1355_s13 = int_to_ptr.vmem [resolvable:$true] %s1354_s13 }
 0x176   : > { %s2219_s12 = scalar_lea.hbm %s2281_s5, %s1528_s23  ;;  %s2294_s10 = sand.u32 1, %s1808_s19  }
 0x177   : > { %s1341_s7 = scalar_lea.sflag [#allocation5], %s2294_s10  ;;  %s1730_s21 = scalar_lea.vmem %s1355_s13, 128 }
 0x178   : > { %p1731_p8 = scmp.ne.s32.totalorder %s1355_s13, %s1730_s21  ;;  %s1846_s6 = smov [#allocation4]  }
 0x179   : > { %s1734_s0 = sshll.u32 %s1846_s6, 4  ;;  %s1735_s0 = int_to_ptr.vmem [resolvable:$false] %s1734_s0 }
 0x17a   : > { %p1732_p9 = pnand %p1731_p8, %p1949_p7  ;;  %s1736_s26 = scalar_lea.vmem %s1735_s0, 256 }
 0x17b   : > { %p1737_p11 = scmp.lt.s32.totalorder %s1355_s13, %s1735_s0  ;;  %p1738_p13 = scmp.lt.s32.totalorder %s1736_s26, %s1730_s21 }
 0x17c   : > { %p1733_p10 = pneg %p1732_p9 }
 0x17d   : > { %p1739_p0 = por %p1738_p13, %p1737_p11 }
 0x17f   : > { %p1740_p1 = pnand %p1739_p0, %p1733_p10 }
 0x181   : > { %1743 = shalt.err (!%p1740_p1)
}
 0x182   : > { %s1744_s24 = scalar_lea.hbm %s2219_s12, 128  ;;  %s1748_s30 = scalar_lea.hbm %s2281_s5, 256 }
 0x183   : > { %p1745_p2 = scmp.ne.s32.totalorder %s2219_s12, %s1744_s24  ;;  %p1749_p5 = scmp.lt.u32.totalorder %s2219_s12, %s2281_s5 }
 0x184   : > { %p1750_p6 = scmp.lt.u32.totalorder %s1748_s30, %s1744_s24  ;;  %p1752_p9 = scmp.lt.u32.totalorder %s1744_s24, %s2219_s12 }
 0x185   : > { %p1746_p3 = pnand %p1745_p2, %p1949_p7 }
 0x186   : > { %p1751_p8 = por %p1750_p6, %p1749_p5 }
 0x187   : > { %p1747_p4 = pneg %p1746_p3 }
 0x188   : > { %p1753_p10 = por %p1752_p9, %p1751_p8 }
 0x18a   : > { %p1754_p11 = pnand %p1753_p10, %p1747_p4 }
 0x18c   : > { %1757 = shalt.err (!%p1754_p11)
}
 0x18d   : > { %1621 = dma.vmem_to_hbm [thread:$0]  (%p1949_p7), %s1355_s13, 128, %s2219_s12, %s1341_s7  }
 0x18e PF: > { %p1627_p13 = scmp.ge.s32.totalorder %s1840_s27, 2  ;;  %s1366_s29 = sand.u32 1, %s1804_s18  }
 0x18f   : > { %s1367_s8 = scalar_lea.sflag [#allocation5], %s1366_s29 }
 0x190   : > { %p1624_p0 = pnand %p1627_p13, %p1957_p12 }
 0x192   : > { %1799 = dma.done.wait (!%p1624_p0), %s1367_s8, 128  }
 0x193   : > { %1801 = vsyncadd (!%p1624_p0), %s1367_s8, 4294967168  ;;  %s18_s27 = sadd.s32 1, %s1840_s27   ;;  %s2295_s24 = sld [smem:[#allocation7_spill]] }
 0x194   : > { %p15_p1 = scmp.ge.s32.totalorder %s18_s27, 10   ;;  %s2296_s11 = sld [smem:[#allocation8_spill]] }
 0x195   : > { %s2297_s26 = sld [smem:[#allocation9_spill]]  ;;  %s2298_s18 = smov %s1808_s19 }
 0x196   : > { %s2299_s19 = smov %s1812_s20  ;;  %s2300_s20 = smov %s1962_s15 }
 0x197   : > { %s2301_s21 = smov %s1820_s22  ;;  %s2302_s22 = smov %s1965_s16 }
 0x198   : > { %s2303_s23 = smov %s1832_s25  ;;  %17 = sbr.rel (!%p15_p1) target bundleno = 8 (0x8), region = 139 }
 0x19a   : > { %s2304_s25 = smov %s2296_s11 }
 0x19f   :  { %1372 = vsyncpa [#allocation5], 1 }
 0x1a0   :  { %1374 = vsyncpa [#allocation5 + $0x1], 1 }

</bundles_post_ra>
